<compile_context>
chip_gen: v7x
topology: tpu7x:2x2x1
jax: 0.10.0
libtpu: 0.0.40
codegen_flags: <defaults>
</compile_context>

<pallas_src>
import functools

import jax
import jax.numpy as jnp
from jax.experimental import pallas as pl
from jax.experimental.pallas import tpu as pltpu

_LANE = 128  # TPU vreg lane width


def _round_up(x, m):
    return ((x + m - 1) // m) * m


def _cdiv(a, b):
    return (a + b - 1) // b


def _mlp_kernel(n_hidden, compute_dtype, *refs):
    """One batch tile (batch on lanes) of the ValueCritic MLP forward.

    refs = (obs_ref(ob_dim, TB),
            w0(out,in), b0(out,1), ..., w_last(H,1), b_last(1,1),
            out_ref(1, TB))
    Hidden layers: MXU matmul (bf16 operands, f32 accum) + lane-dense
    bias/tanh on VPU/EUP.  Final Linear(H->1): VPU multiply + sublane
    reduce (XLU), producing a lane-dense (1, TB) result.
    """
    obs_ref = refs[0]
    out_ref = refs[-1]
    param_refs = refs[1:-1]

    x = obs_ref[...]  # (ob_dim, TB) f32, batch on lanes

    for i in range(n_hidden):
        w = param_refs[2 * i][...]        # (out, in)  compute_dtype (MXU operand)
        b = param_refs[2 * i + 1][...]    # (out, 1)   f32, broadcast over lanes
        y = jnp.dot(w, x.astype(compute_dtype),
                    preferred_element_type=jnp.float32)   # (out, TB), f32 accum
        x = jnp.tanh(y + b)               # VPU + EUP, full 128-lane utilization

    w_last = param_refs[2 * n_hidden][...]      # (H, 1) f32
    b_last = param_refs[2 * n_hidden + 1][...]  # (1, 1) f32
    # Broadcast-multiply + sublane reduce instead of an M=1 MXU matmul.
    v = jnp.sum(x * w_last, axis=0, keepdims=True) + b_last   # (1, TB)
    out_ref[...] = v.astype(out_ref.dtype)


def value_critic_forward(obs, params, *, tb_max=4096, compute_dtype=jnp.bfloat16):
    """ValueCritic MLP forward as a batch-tiled (batch-on-lanes) Pallas kernel.

    Args:
      obs: (B, ob_dim) float32 observations.
      params: list of (W, b) in PyTorch-native shapes: W (out, in), b (out,).
      tb_max: cap on the batch tile size (rounded down to a multiple of 128).
      compute_dtype: MXU operand dtype for hidden layers (bf16 default;
        accumulation is always f32).  Pass jnp.float32 for exact f32 math.
    Returns:
      (B,) float32 values.
    """
    B, ob_dim = obs.shape
    n_linear = len(params)

    # --- Tile / padding policy -------------------------------------------
    # Guard: lane-aligned tile cap (unaligned tb_max can't break lowering).
    tb_max = max(_LANE, (tb_max // _LANE) * _LANE)
    B_pad_min = _round_up(B, _LANE)
    num_tiles = _cdiv(B_pad_min, tb_max)
    if num_tiles < 2 and B_pad_min >= 2 * _LANE:
        num_tiles = 2  # v7x megacore: give both TensorCores a tile
    TB = _round_up(_cdiv(B_pad_min, num_tiles), _LANE)
    B_pad = num_tiles * TB  # waste bounded by < 1 tile + lane rounding

    # --- Layout prep (once per call, tiny XLA ops) -------------------------
    # Transpose obs so batch lands on the lane axis inside the kernel.
    obs_t = obs.astype(jnp.float32).T                  # (ob_dim, B)
    if B_pad != B:
        obs_t = jnp.pad(obs_t, ((0, 0), (0, B_pad - B)))

    flat_params = []
    in_specs = [pl.BlockSpec((ob_dim, TB), lambda i: (0, i))]
    for li, (w, b) in enumerate(params):
        if li == n_linear - 1:
            # Final layer weight as an (H, 1) column for the VPU epilogue.
            w_k = w.reshape(-1, 1).astype(jnp.float32)
        else:
            # Hidden weights stay PyTorch-native (out, in); cast once to the
            # MXU operand dtype in the wrapper (they stay resident in VMEM
            # across all grid steps thanks to the constant index_map).
            w_k = w.astype(compute_dtype)
        b_k = b.reshape(-1, 1).astype(jnp.float32)      # (out, 1)
        flat_params.extend([w_k, b_k])
        in_specs.append(pl.BlockSpec(w_k.shape, lambda i: (0, 0)))
        in_specs.append(pl.BlockSpec(b_k.shape, lambda i: (0, 0)))

    # --- Advisory cost estimate for XLA's scheduler ------------------------
    flops = 0
    transcendentals = 0
    for li, (w, b) in enumerate(params):
        out_d, in_d = w.shape
        flops += 2 * B_pad * in_d * out_d + B_pad * out_d
        if li < n_linear - 1:
            transcendentals += B_pad * out_d
    param_bytes = sum(a.size * a.dtype.itemsize for a in flat_params)
    bytes_accessed = B_pad * ob_dim * 4 + param_bytes + B_pad * 4

    out = pl.pallas_call(
        functools.partial(_mlp_kernel, n_linear - 1, compute_dtype),
        out_shape=jax.ShapeDtypeStruct((1, B_pad), jnp.float32),
        grid=(num_tiles,),
        in_specs=in_specs,
        out_specs=pl.BlockSpec((1, TB), lambda i: (0, i)),   # lane-dense store
        compiler_params=pltpu.CompilerParams(
            dimension_semantics=("parallel",)),
        cost_estimate=pl.CostEstimate(
            flops=flops,
            transcendentals=transcendentals,
            bytes_accessed=bytes_accessed),
    )(obs_t, *flat_params)

    # PyTorch `.squeeze()` glue (shape-only op in plain JAX).
    # TODO(synk): for B == 1 PyTorch returns a 0-d tensor; we always return (B,).
    return out[0, :B]


def init_value_critic_params(key, ob_dim, n_layers, layer_size):
    """PyTorch-native init: W (out, in), b (out,), uniform(+-1/sqrt(fan_in))."""
    dims = [ob_dim] + [layer_size] * n_layers + [1]
    params = []
    for i in range(len(dims) - 1):
        fan_in, fan_out = dims[i], dims[i + 1]
        key, kw, kb = jax.random.split(key, 3)
        bound = 1.0 / float(jnp.sqrt(jnp.float32(fan_in)))
        w = jax.random.uniform(kw, (fan_out, fan_in), jnp.float32, -bound, bound)
        b = jax.random.uniform(kb, (fan_out,), jnp.float32, -bound, bound)
        params.append((w, b))
    return params


def _reference_forward(obs, params, compute_dtype=None):
    """Pure-JAX reference.  If compute_dtype is given, mirrors the kernel's
    reduced-precision hidden matmuls (f32 accumulation)."""
    x = obs.astype(jnp.float32)
    n = len(params)
    for i, (w, b) in enumerate(params):
        if compute_dtype is not None and i < n - 1:
            y = jnp.dot(x.astype(compute_dtype), w.T.astype(compute_dtype),
                        preferred_element_type=jnp.float32) + b
        else:
            y = x @ w.T + b
        x = jnp.tanh(y) if i < n - 1 else y
    return jnp.squeeze(x, axis=-1)


if __name__ == "__main__":
    # Shapes consistent with ValueCritic(ob_dim=16, n_layers=2, layer_size=32, lr=...)
    B, OB_DIM, N_LAYERS, LAYER_SIZE = 8, 16, 2, 32

    key = jax.random.PRNGKey(0)
    key, k_obs = jax.random.split(key)
    obs = jax.random.normal(k_obs, (B, OB_DIM), dtype=jnp.float32)
    params = init_value_critic_params(key, OB_DIM, N_LAYERS, LAYER_SIZE)

    values = jax.block_until_ready(value_critic_forward(obs, params))
    ref_bf16 = _reference_forward(obs, params, compute_dtype=jnp.bfloat16)
    ref_f32 = _reference_forward(obs, params)
    assert values.shape == (B,), values.shape
    assert jnp.allclose(values, ref_bf16, atol=1e-4, rtol=1e-4), (values, ref_bf16)
    assert jnp.allclose(values, ref_f32, atol=5e-2, rtol=5e-2), (values, ref_f32)

    # Multi-tile grid + padding path (B not a multiple of 128, >= 2 tiles).
    B2 = 300
    key, k_obs2 = jax.random.split(key)
    obs2 = jax.random.normal(k_obs2, (B2, OB_DIM), dtype=jnp.float32)
    values2 = jax.block_until_ready(value_critic_forward(obs2, params, tb_max=128))
    ref2_bf16 = _reference_forward(obs2, params, compute_dtype=jnp.bfloat16)
    assert values2.shape == (B2,), values2.shape
    assert jnp.allclose(values2, ref2_bf16, atol=1e-4, rtol=1e-4), (values2, ref2_bf16)

    # Exact f32 compute path + unaligned tb_max guard (200 -> 128).
    values3 = jax.block_until_ready(
        value_critic_forward(obs2, params, tb_max=200, compute_dtype=jnp.float32))
    ref2_f32 = _reference_forward(obs2, params)
    assert jnp.allclose(values3, ref2_f32, atol=1e-5, rtol=1e-5), (values3, ref2_f32)

    print("KERNEL_OK")
</pallas_src>

<mosaic_0001>
module attributes {stable_mosaic.version = 11 : i64} {
  func.func @_mlp_kernel(%arg0: i32, %arg1: memref<16x128xf32, #tpu.memory_space<vmem>>, %arg2: memref<32x16xbf16, #tpu.memory_space<vmem>>, %arg3: memref<32x1xf32, #tpu.memory_space<vmem>>, %arg4: memref<32x32xbf16, #tpu.memory_space<vmem>>, %arg5: memref<32x1xf32, #tpu.memory_space<vmem>>, %arg6: memref<32x1xf32, #tpu.memory_space<vmem>>, %arg7: memref<1x1xf32, #tpu.memory_space<vmem>>, %arg8: memref<1x128xf32, #tpu.memory_space<vmem>>) attributes {dimension_semantics = [#tpu.dimension_semantics<parallel>], iteration_bounds = array<i64: 1>, scalar_prefetch = 0 : i64, scratch_operands = 0 : i64, tpu.core_type = #tpu.core_type<tc>, window_params = [{transform_indices = @transform_0, window_bounds = array<i64: 16, 128>}, {pipeline_mode = #tpu.pipeline_mode<synchronous>, transform_indices = @transform_1, window_bounds = array<i64: 32, 16>}, {pipeline_mode = #tpu.pipeline_mode<synchronous>, transform_indices = @transform_2, window_bounds = array<i64: 32, 1>}, {pipeline_mode = #tpu.pipeline_mode<synchronous>, transform_indices = @transform_3, window_bounds = array<i64: 32, 32>}, {pipeline_mode = #tpu.pipeline_mode<synchronous>, transform_indices = @transform_4, window_bounds = array<i64: 32, 1>}, {pipeline_mode = #tpu.pipeline_mode<synchronous>, transform_indices = @transform_5, window_bounds = array<i64: 32, 1>}, {pipeline_mode = #tpu.pipeline_mode<synchronous>, transform_indices = @transform_6, window_bounds = array<i64: 1, 1>}, {transform_indices = @transform_7, window_bounds = array<i64: 1, 128>}]} {
    %c0 = arith.constant 0 : index
    %c0_0 = arith.constant 0 : index
    %0 = vector.load %arg1[%c0, %c0_0] : memref<16x128xf32, #tpu.memory_space<vmem>>, vector<16x128xf32>
    %c0_1 = arith.constant 0 : index
    %c0_2 = arith.constant 0 : index
    %1 = vector.load %arg2[%c0_1, %c0_2] : memref<32x16xbf16, #tpu.memory_space<vmem>>, vector<32x16xbf16>
    %c0_3 = arith.constant 0 : index
    %c0_4 = arith.constant 0 : index
    %2 = vector.load %arg3[%c0_3, %c0_4] : memref<32x1xf32, #tpu.memory_space<vmem>>, vector<32x1xf32>
    %3 = arith.truncf %0 : vector<16x128xf32> to vector<16x128xbf16>
    %cst = arith.constant dense<0.000000e+00> : vector<32x128xf32>
    %4 = tpu.matmul %1, %3, %cst {dimension_numbers = #tpu.dot_dimension_numbers<[1], [0], [0], [1], [0, 0, 1, 1], [], []>} : vector<32x16xbf16>, vector<16x128xbf16>, vector<32x128xf32> -> vector<32x128xf32>
    %5 = vector.broadcast %2 : vector<32x1xf32> to vector<32x128xf32>
    %6 = arith.addf %4, %5 : vector<32x128xf32>
    %7 = math.tanh %6 : vector<32x128xf32>
    %c0_5 = arith.constant 0 : index
    %c0_6 = arith.constant 0 : index
    %8 = vector.load %arg4[%c0_5, %c0_6] : memref<32x32xbf16, #tpu.memory_space<vmem>>, vector<32x32xbf16>
    %c0_7 = arith.constant 0 : index
    %c0_8 = arith.constant 0 : index
    %9 = vector.load %arg5[%c0_7, %c0_8] : memref<32x1xf32, #tpu.memory_space<vmem>>, vector<32x1xf32>
    %10 = arith.truncf %7 : vector<32x128xf32> to vector<32x128xbf16>
    %cst_9 = arith.constant dense<0.000000e+00> : vector<32x128xf32>
    %11 = tpu.matmul %8, %10, %cst_9 {dimension_numbers = #tpu.dot_dimension_numbers<[1], [0], [0], [1], [0, 0, 1, 1], [], []>} : vector<32x32xbf16>, vector<32x128xbf16>, vector<32x128xf32> -> vector<32x128xf32>
    %12 = vector.broadcast %9 : vector<32x1xf32> to vector<32x128xf32>
    %13 = arith.addf %11, %12 : vector<32x128xf32>
    %14 = math.tanh %13 : vector<32x128xf32>
    %c0_10 = arith.constant 0 : index
    %c0_11 = arith.constant 0 : index
    %15 = vector.load %arg6[%c0_10, %c0_11] : memref<32x1xf32, #tpu.memory_space<vmem>>, vector<32x1xf32>
    %c0_12 = arith.constant 0 : index
    %c0_13 = arith.constant 0 : index
    %16 = vector.load %arg7[%c0_12, %c0_13] : memref<1x1xf32, #tpu.memory_space<vmem>>, vector<1x1xf32>
    %17 = vector.broadcast %15 : vector<32x1xf32> to vector<32x128xf32>
    %18 = arith.mulf %14, %17 : vector<32x128xf32>
    %cst_14 = arith.constant dense<0.000000e+00> : vector<128xf32>
    %19 = vector.multi_reduction <add>, %18, %cst_14 [0] : vector<32x128xf32> to vector<128xf32>
    %20 = vector.shape_cast %19 : vector<128xf32> to vector<1x128xf32>
    %21 = vector.broadcast %16 : vector<1x1xf32> to vector<1x128xf32>
    %22 = arith.addf %20, %21 : vector<1x128xf32>
    %c0_15 = arith.constant 0 : index
    %c0_16 = arith.constant 0 : index
    %23 = vector.load %arg8[%c0_15, %c0_16] : memref<1x128xf32, #tpu.memory_space<vmem>>, vector<1x128xf32>
    tpu.vector_store %arg8[%c0_15, %c0_16], %22 {strides = array<i32>} : memref<1x128xf32, #tpu.memory_space<vmem>>, vector<1x128xf32>,
    return
  }
  func.func @transform_0(%arg0: i32) -> (i32, i32) {
    %c0_i32 = arith.constant 0 : i32
    %c0_i32_0 = arith.constant 0 : i32
    return %c0_i32, %arg0 : i32, i32
  }
  func.func @transform_1(%arg0: i32) -> (i32, i32) {
    %c0_i32 = arith.constant 0 : i32
    %c0_i32_0 = arith.constant 0 : i32
    %c0_i32_1 = arith.constant 0 : i32
    return %c0_i32, %c0_i32_0 : i32, i32
  }
  func.func @transform_2(%arg0: i32) -> (i32, i32) {
    %c0_i32 = arith.constant 0 : i32
    %c0_i32_0 = arith.constant 0 : i32
    %c0_i32_1 = arith.constant 0 : i32
    return %c0_i32, %c0_i32_0 : i32, i32
  }
  func.func @transform_3(%arg0: i32) -> (i32, i32) {
    %c0_i32 = arith.constant 0 : i32
    %c0_i32_0 = arith.constant 0 : i32
    %c0_i32_1 = arith.constant 0 : i32
    return %c0_i32, %c0_i32_0 : i32, i32
  }
  func.func @transform_4(%arg0: i32) -> (i32, i32) {
    %c0_i32 = arith.constant 0 : i32
    %c0_i32_0 = arith.constant 0 : i32
    %c0_i32_1 = arith.constant 0 : i32
    return %c0_i32, %c0_i32_0 : i32, i32
  }
  func.func @transform_5(%arg0: i32) -> (i32, i32) {
    %c0_i32 = arith.constant 0 : i32
    %c0_i32_0 = arith.constant 0 : i32
    %c0_i32_1 = arith.constant 0 : i32
    return %c0_i32, %c0_i32_0 : i32, i32
  }
  func.func @transform_6(%arg0: i32) -> (i32, i32) {
    %c0_i32 = arith.constant 0 : i32
    %c0_i32_0 = arith.constant 0 : i32
    %c0_i32_1 = arith.constant 0 : i32
    return %c0_i32, %c0_i32_0 : i32, i32
  }
  func.func @transform_7(%arg0: i32) -> (i32, i32) {
    %c0_i32 = arith.constant 0 : i32
    %c0_i32_0 = arith.constant 0 : i32
    return %c0_i32, %arg0 : i32, i32
  }
}

</mosaic_0001>

<bundles_post_ra>
// kernel: tpu_custom_call.1
= control target key start
LH: loop header
LB: loop body
LE: loop exit
PB: predicated region body
PF: predicated region fallthrough
CT: control target
= control target key end

     0   :  { %s486_s0 = inlined_call_operand.vmem [shape: f32[16,128], index: 0, kind: input, shape index: {}]   ;;  %s487_s1 = inlined_call_operand.vmem [shape: bf16[32,16], index: 1, kind: input, shape index: {}]   ;;  %s488_s2 = inlined_call_operand.vmem [shape: f32[32,1], index: 2, kind: input, shape index: {}]   ;;  %s489_s3 = inlined_call_operand.vmem [shape: bf16[32,32], index: 3, kind: input, shape index: {}]   ;;  %s490_s4 = inlined_call_operand.vmem [shape: f32[32,1], index: 4, kind: input, shape index: {}]   ;;  %s491_s5 = inlined_call_operand.vmem [shape: f32[32,1], index: 5, kind: input, shape index: {}]   ;;  %s492_s6 = inlined_call_operand.<no memory space> [shape: f32[1,1], index: 6, kind: input, shape index: {}]   ;;  %s493_s7 = inlined_call_operand.hbm [shape: f32[1,128], index: 7, kind: output, shape index: {}]  }
   0x1   :  { %v12_v0 = vstv %s492_s6 }
   0x2   :  { %13 = vst [vmem:[#allocation2] sm:$0x1] %v12_v0 }
   0x3   :  { %v30_v1 = vld [vmem:[%s486_s0] sm:$0xff]  ;;  %v31_v2 = vld [vmem:[%s486_s0 + $0x8] sm:$0xff]  ;;  %vm71_vm0 = vcmask 130048   ;;  %v371_v5 = vmov 0   ;;  %v38_v8 = vld [vmem:[%s488_s2 + $0x10] sm:$0xff] }
   0x4   :  { %v40_v3 = vpack.c.bf16 %v31_v2, %v30_v1  ;;  %v327_v4 = vld [vmem:[%s487_s1] sm:$0xff]   ;;  %325 = vset.pattern.permute.xlu0 %v371_v5  ;;  %326 = vset.pattern.permute.xlu1 %v371_v5  ;;  %v328_v7 = vld [vmem:[%s487_s1 + $0x8] sm:$0xff]   ;;  %v39_v10 = vld [vmem:[%s488_s2 + $0x18] sm:$0xff] }
   0x5   :  { %v36_v6 = vld [vmem:[%s488_s2] sm:$0xff]  ;;  %311 = vmatprep.mubr.msk.bf16.mxu0 %vm71_vm0, %v327_v4  ;;  %v37_v9 = vld [vmem:[%s488_s2 + $0x8] sm:$0xff]  ;;  %53 = vperm.xlu1 %326, %v38_v8  }
   0x6   :  { %309 = vmatprep.subr.bf16.mxu0 %v40_v3  ;;  %43 = vperm.xlu0 %325, %v36_v6  }
   0x7   :  { %310 = vmatpush3.bf16.msra.mxu0 %v40_v3 }
   0xa   :  { %312 = vmatmul.mubr.msk.bf16.vlgmr.msra.gmra.mrb[0].mxu0 %vm71_vm0, %v328_v7  ;;  %48 = vperm.xlu0 %325, %v37_v9  }
   0xb   :  { %14 = vsyncpa [#allocation4], 0  ;;  %v135_v11 = vld [vmem:[%s490_s4] sm:$0xff]  ;;  %58 = vperm.xlu1 %326, %v39_v10   ;;  %v136_v12 = vld [vmem:[%s490_s4 + $0x8] sm:$0xff]  ;;  %vm171_vm1 = vcmask 261120   ;;  %v274_v2 = vlaneseq }
   0xc   :  { %v137_v13 = vld [vmem:[%s490_s4 + $0x10] sm:$0xff]  ;;  %v138_v14 = vld [vmem:[%s490_s4 + $0x18] sm:$0xff]  ;;  %v231_v15 = vld [vmem:[%s491_s5] sm:$0xff] }
   0xd   :  { %v232_v16 = vld [vmem:[%s491_s5 + $0x8] sm:$0xff]  ;;  %v233_v17 = vld [vmem:[%s491_s5 + $0x10] sm:$0xff]  ;;  %v234_v18 = vld [vmem:[%s491_s5 + $0x18] sm:$0xff]  ;;  %v275_v5 = vshrl.u32 %v274_v2, 7 }
   0xe   :  { %143 = vperm.xlu0 %325, %v135_v11   ;;  %v235_v19 = vld [vmem:[#allocation2] sm:$0x1]  ;;  %v330_v39 = vld [vmem:[%s489_s3 + $0x8] sm:$0xff]  }
   0xf   :  { %148 = vperm.xlu1 %326, %v136_v12   ;;  %v329_v20 = vld [vmem:[%s489_s3] sm:$0xff]   ;;  %v276_v8 = vsub.s32 0, %v275_v5  ;;  %s372_s3 = smov [#allocation3]  }
  0x10   :  { %319 = vmatprep.mubr.msk.bf16.mxu1 %vm171_vm1, %v329_v20  ;;  %s286_s6 = sshll.u32 %s372_s3, 4  ;;  %s287_s6 = int_to_ptr.vmem [resolvable:$true] %s286_s6 }
  0x11   :  { %s347_s10 = scalar_lea.vmem %s287_s6, 16  ;;  %s351_s11 = scalar_lea.vmem %s287_s6, 32 }
  0x12   :  { %153 = vperm.xlu0 %325, %v137_v13   ;;  %p348_p0 = scmp.ne.s32.totalorder %s287_s6, %s347_s10  ;;  %p352_p1 = scmp.lt.s32.totalorder %s287_s6, %s287_s6 }
  0x13   :  { %158 = vperm.xlu1 %326, %v138_v14   ;;  %p353_p2 = scmp.lt.s32.totalorder %s351_s11, %s347_s10 }
  0x15   :  { %p354_p3 = por %p353_p2, %p352_p1 }
  0x16   :  { %238 = vperm.xlu0 %325, %v231_v15  }
  0x17   :  { %243 = vperm.xlu1 %326, %v232_v16   ;;  %p355_p4 = pnand %p354_p3, %p348_p0 }
  0x1a   :  { %248 = vperm.xlu0 %325, %v233_v17  }
  0x1b   :  { %253 = vperm.xlu1 %326, %v234_v18  }
  0x1e   :  { %271 = vperm.xlu0 %325, %v235_v19  }
  0x84   :  { %v54_v21 = vpop.permute.xlu1 %53 }
  0x85   :  { %v44_v22 = vpop.permute.xlu0 %43 }
  0x89   :  { %v49_v29 = vpop.permute.xlu0 %48 }
  0x8a   :  { %v59_v26 = vpop.permute.xlu1 %58 }
  0x8d   :  { %v144_v40 = vpop.permute.xlu0 %143 }
  0x8e   :  { %v149_v41 = vpop.permute.xlu1 %148 }
  0x91   :  { %v154_v42 = vpop.permute.xlu0 %153 }
  0x92   :  { %v159_v48 = vpop.permute.xlu1 %158 }
  0x95   :  { %v239_v52 = vpop.permute.xlu0 %238 }
  0x96   :  { %v244_v54 = vpop.permute.xlu1 %243 }
  0x99   :  { %v249_v60 = vpop.permute.xlu0 %248 }
  0x9a   :  { %v254_v63 = vpop.permute.xlu1 %253 }
  0x9d   :  { %v272_v10 = vpop.permute.xlu0 %271 }
  0x9e   :  { %v277_v12 = vrot.slane %v272_v10, %v276_v8 }
  0xdd   :  { %v313_v23 = vpop.f32.mrb[0].mxu0 }
  0xde   :  { %v121_v24 = vadd.f32 %v313_v23, %v54_v21  ;;  %v112_v25 = vpop.f32.mrb[1].mxu0 }
  0xdf   :  { %v113_v27 = vadd.f32 %v112_v25, %v44_v22  ;;  %v314_v28 = vpop.f32.mrb[2].mxu0 }
  0xe0   :  { %331 = vtanh.f32 %v121_v24  ;;  %v124_v30 = vadd.f32 %v314_v28, %v59_v26  ;;  %v115_v31 = vpop.f32.mrb[3].mxu0 }
  0xe1   :  { %333 = vtanh.f32 %v113_v27  ;;  %v116_v32 = vadd.f32 %v115_v31, %v49_v29 }
  0xe2   :  { %335 = vtanh.f32 %v124_v30 }
  0xe3   :  { %337 = vtanh.f32 %v116_v32 }
  0xea   :  { %v332_v33 = vpop.eup %331 }
  0xeb   :  { %v334_v34 = vpop.eup %333 }
  0xec   :  { %v336_v35 = vpop.eup %335 }
  0xed   :  { %v338_v36 = vpop.eup %337  ;;  %v140_v37 = vpack.c.bf16 %v336_v35, %v332_v33 }
  0xee   :  { %v139_v38 = vpack.c.bf16 %v338_v36, %v334_v34 }
  0xf0   :  { %315 = vmatprep.subr.bf16.mxu1 %v139_v38 }
  0xf1   :  { %316 = vmatpush3.bf16.msra.mxu1 %v139_v38 }
  0xf2   :  { %317 = vmatprep.subr.bf16.mxu1 %v140_v37 }
  0xf5   :  { %318 = vmatpush3.bf16.msra.mxu1 %v140_v37 }
  0xf8   :  { %320 = vmatmul.mubr.msk.bf16.vlgmr.msra.gmra.mrb[0].mxu1 %vm171_vm1, %v330_v39 }
 0x1cb   :  { %v321_v43 = vpop.f32.mrb[0].mxu1 }
 0x1cc   :  { %v221_v44 = vadd.f32 %v321_v43, %v154_v42  ;;  %v212_v45 = vpop.f32.mrb[1].mxu1 }
 0x1cd   :  { %v213_v46 = vadd.f32 %v212_v45, %v144_v40  ;;  %v322_v47 = vpop.f32.mrb[2].mxu1 }
 0x1ce   :  { %v215_v49 = vpop.f32.mrb[3].mxu1  ;;  %v224_v50 = vadd.f32 %v322_v47, %v159_v48 }
 0x1cf   :  { %339 = vtanh.f32 %v213_v46  ;;  %v216_v51 = vadd.f32 %v215_v49, %v149_v41 }
 0x1d0   :  { %341 = vtanh.f32 %v221_v44 }
 0x1d1   :  { %343 = vtanh.f32 %v216_v51 }
 0x1d2   :  { %345 = vtanh.f32 %v224_v50 }
 0x1d9   :  { %v340_v53 = vpop.eup %339 }
 0x1da   :  { %v342_v55 = vpop.eup %341  ;;  %v256_v57 = vmul.f32 %v340_v53, %v239_v52 }
 0x1db   :  { %v344_v56 = vpop.eup %343  ;;  %v258_v61 = vmul.f32 %v342_v55, %v249_v60 }
 0x1dc   :  { %v257_v58 = vmul.f32 %v344_v56, %v244_v54  ;;  %v346_v59 = vpop.eup %345 }
 0x1dd   :  { %v259_v0 = vmul.f32 %v346_v59, %v254_v63 }
 0x1de   :  { %v260_v62 = vadd.f32 %v257_v58, %v256_v57 }
 0x1e0   :  { %v261_v1 = vadd.f32 %v260_v62, %v258_v61 }
 0x1e2   :  { %v262_v3 = vadd.f32 %v261_v1, %v259_v0 }
 0x1e4   :  { %v263_v4 = vrot.slane %v262_v3, 4 }
 0x1e6   :  { %v264_v6 = vadd.f32 %v263_v4, %v262_v3 }
 0x1e8   :  { %v265_v7 = vrot.slane %v264_v6, 2 }
 0x1ea   :  { %v266_v9 = vadd.f32 %v265_v7, %v264_v6 }
 0x1ec   :  { %v267_v11 = vrot.slane %v266_v9, 1 }
 0x1ee   :  { %v268_v13 = vadd.f32 %v267_v11, %v266_v9 }
 0x1f0   :  { %v278_v14 = vadd.f32 %v277_v12, %v268_v13 }
 0x1f2   :  { %279 = vst [vmem:[#allocation3] sm:$0x1] %v278_v14 }
 0x1f3   :  { %358 = shalt.err (!%p355_p4)
}
 0x1f4   :  { %s359_s13 = scalar_lea.hbm %s493_s7, 16 }
 0x1f5   :  { %p360_p5 = scmp.ne.s32.totalorder %s493_s7, %s359_s13  ;;  %p363_p6 = scmp.lt.u32.totalorder %s359_s13, %s493_s7 }
 0x1f7   :  { %p365_p7 = pnand %p363_p6, %p360_p5 }
 0x1f9   :  { %368 = shalt.err (!%p365_p7)
}
 0x1fa   :  { %289 = dma.vmem_to_hbm [thread:$0]  %s287_s6, 16, %s493_s7, [#allocation4]  }
 0x1fb   :  { %369 = dma.done.wait [#allocation4], 16  }
 0x1fc   :  { %370 = vsyncadd [#allocation4], 4294967280 }
 0x1fd   :  { %293 = vsyncpa [#allocation4], 1 }

</bundles_post_ra>
